<compile_context>
chip_gen: v7x
topology: tpu7x:2x2x1
jax: 0.10.0
libtpu: 0.0.40
codegen_flags: <defaults>
</compile_context>

<pallas_src>
import jax
import jax.numpy as jnp
from jax.experimental import pallas as pl
from jax.experimental.pallas import tpu as pltpu


def _wad_kernel(x_ref, o_ref):
    Nb, C, Ht, W = x_ref.shape
    Hh = Ht // 2
    Wh = W // 2
    dt = x_ref.dtype

    # Even / odd input rows via sublane-strided reads (row-direction Haar
    # mixing is pure data movement + VPU adds; no row matmuls, no filter DMAs).
    r0 = x_ref[:, :, pl.ds(0, Hh, stride=2), :]      # rows 0,2,4,...  (Nb,C,Hh,W)
    r1 = x_ref[:, :, pl.ds(1, Hh, stride=2), :]      # rows 1,3,5,...

    # Fold (Nb, C, Hh) into one long M dim so the column down-mix is one/two
    # large 2-D MXU matmuls instead of Nb*C tiny batched ones.
    M = Nb * C * Hh
    r0m = r0.reshape(M, W)
    r1m = r1.reshape(M, W)

    # Constant 0/1 even-column selection matrix, built in registers (no HBM
    # filter operands, no per-call filter DMAs).
    i_in = jax.lax.broadcasted_iota(jnp.int32, (W, Wh), 0)
    j_out = jax.lax.broadcasted_iota(jnp.int32, (W, Wh), 1)
    ce = (i_in == 2 * j_out).astype(dt)              # picks even input columns

    f32 = jnp.float32
    if W >= 128:
        # Lane-roll fusion: pre-combine adjacent columns on the VPU/XLU
        # (both slots are otherwise idle), then one even-column compaction per
        # result -> 2 MXU matmuls instead of 3.  pltpu.roll follows jnp.roll
        # semantics; shift = W-1 is the circular "next column" shift
        # (result[..., j] = x[..., j+1]).  The wrapped last column only
        # pollutes odd columns, which `ce` multiplies by zero.
        rsm = r0m + r1m
        t = rsm + pltpu.roll(rsm, W - 1, 1)          # even cols: a + b + c + d
        u = r0m - pltpu.roll(r1m, W - 1, 1)          # even cols: a - d
        llp = jnp.matmul(t, ce, preferred_element_type=f32)
        s = jnp.matmul(u, ce, preferred_element_type=f32)
    else:
        # Small-W path: selection matmuls are negligible; keep the simple,
        # proven exact 3-matmul form.
        co = (i_in == 2 * j_out + 1).astype(dt)      # picks odd input columns
        cl = ce + co                                 # sums adjacent column pairs
        rsm = r0m + r1m
        a = jnp.matmul(r0m, ce, preferred_element_type=f32)     # x[0::2, 0::2]
        d = jnp.matmul(r1m, co, preferred_element_type=f32)     # x[1::2, 1::2]
        llp = jnp.matmul(rsm, cl, preferred_element_type=f32)   # a + b + c + d
        s = a - d

    ll = (0.5 * llp).reshape(Nb, C, Hh, Wh)          # LL sub-band
    s = s.reshape(Nb, C, Hh, Wh)                     # LH + HL (exact for Haar)

    # Softmax2d == softmax over the channel axis, independently per pixel.
    m = jnp.max(s, axis=1, keepdims=True)
    e = jnp.exp(s - m)
    den = jnp.sum(e, axis=1, keepdims=True)
    # approx reciprocal (pure EUP slot) is well below output precision for
    # sub-f32 dtypes; keep the refined one for f32 so f32 outputs stay exact.
    approx = jnp.dtype(dt).itemsize < 4
    sm = e * pl.reciprocal(den, approx=bool(approx))

    o_ref[...] = (ll + ll * sm).astype(o_ref.dtype)


def _divisors(n):
    return [d for d in range(1, n + 1) if n % d == 0]


def _pick_tiles(N, C, H, W, itemsize):
    """Pick (batch tile Nb, height tile Ht, width tile Wt).

    Rules:
      * input block <= ~4 MiB (double-buffered by the pipeline; in-kernel f32
        intermediates add roughly another 3-4x, all covered by the explicit
        vmem_limit_bytes), big enough to amortize the ~0.35us step overhead;
      * Ht a multiple of 2*sublane (16 for f32, 32 for bf16, 64 for int8) or
        the full H, so both the input block and the half-height output block
        stay sublane-aligned;
      * Wt a multiple of 256 or the full W, so input Wt and output Wt/2 stay
        128-lane aligned (softmax is per-pixel over C, so W tiling is legal);
      * >= 2 grid steps whenever the problem allows it (pipelining + both
        v7x TensorCores).
    """
    sub = {4: 8, 2: 16, 1: 32}.get(itemsize, 8)
    row_mult = 2 * sub
    BLOCK_BUDGET = 4 << 20

    def blk_bytes(ht, wt):
        return C * ht * wt * itemsize

    h_tiles = [d for d in _divisors(H) if d % row_mult == 0]
    w_tiles = [d for d in _divisors(W) if d % 256 == 0]

    Ht, Wt = H, W
    if blk_bytes(H, W) > BLOCK_BUDGET:
        ok_h = [d for d in h_tiles if blk_bytes(d, W) <= BLOCK_BUDGET]
        if ok_h:
            Ht = max(ok_h)
        else:
            Ht = min(h_tiles) if h_tiles else H
            ok_w = [d for d in w_tiles if blk_bytes(Ht, d) <= BLOCK_BUDGET]
            if ok_w:
                Wt = max(ok_w)
            elif w_tiles:
                Wt = min(w_tiles)
            # else: no clean spatial tiling; fall back to one big block per
            # batch element and rely on the raised vmem limit.

    # Batch packing: when the spatial grid is a single step, pack several
    # small images per block so each grid step moves enough bytes...
    Nb = 1
    if Ht == H and Wt == W:
        fits = [d for d in _divisors(N) if d * blk_bytes(H, W) <= BLOCK_BUDGET]
        if fits:
            Nb = max(fits)
        # ...but keep >= 2 grid steps when N allows it.
        if N >= 2 and N // Nb < 2:
            Nb = max(d for d in _divisors(N) if d <= N // 2)

    # Guarantee >= 2 grid steps whenever a legal split exists (v7x megacore;
    # a single-step grid also cannot overlap DMA with compute).
    steps = (N // Nb) * (H // Ht) * (W // Wt)
    if steps < 2:
        smaller_h = [d for d in h_tiles if d < H]
        smaller_w = [d for d in w_tiles if d < W]
        if smaller_h:
            Ht = max(smaller_h)
        elif smaller_w:
            Wt = max(smaller_w)

    return Nb, Ht, Wt


def _vmem_limit_bytes():
    """Generation-aware scoped-VMEM limit (~3/4 of physical, 32..96 MiB)."""
    cap = 64 << 20
    try:
        info = pltpu.get_tpu_info()
        cap = int(getattr(info, "vmem_capacity_bytes", cap))
    except Exception:
        pass
    return int(min(96 << 20, max(32 << 20, (cap * 3) // 4)))


def wad_forward(x):
    """x: (N, C, H, W). Returns LL + LL * softmax_C(LH + HL), shape (N, C, H/2, W/2)."""
    N, C, H, W = x.shape
    assert H % 2 == 0 and W % 2 == 0, "H and W must be even for the Haar DWT"
    Hh, Wh = H // 2, W // 2
    itemsize = jnp.dtype(x.dtype).itemsize
    Nb, Ht, Wt = _pick_tiles(N, C, H, W, itemsize)

    grid = (N // Nb, H // Ht, W // Wt)

    cost = pl.CostEstimate(
        flops=2 * 3 * (N * C * Hh) * W * Wh,             # selection matmuls (worst case)
        transcendentals=N * C * Hh * Wh,                 # exp in the channel softmax
        bytes_accessed=(N * C * H * W + N * C * Hh * Wh) * itemsize,
    )

    return pl.pallas_call(
        _wad_kernel,
        out_shape=jax.ShapeDtypeStruct((N, C, Hh, Wh), x.dtype),
        grid_spec=pltpu.PrefetchScalarGridSpec(
            num_scalar_prefetch=0,
            grid=grid,
            in_specs=[
                pl.BlockSpec((Nb, C, Ht, Wt), lambda n, h, w: (n, 0, h, w)),
            ],
            out_specs=pl.BlockSpec((Nb, C, Ht // 2, Wt // 2),
                                   lambda n, h, w: (n, 0, h, w)),
        ),
        compiler_params=pltpu.CompilerParams(
            dimension_semantics=("parallel", "parallel", "parallel"),
            vmem_limit_bytes=_vmem_limit_bytes(),
        ),
        cost_estimate=cost,
    )(x)


def _ref_forward(x):
    """Pure-JAX reference of the PyTorch wad_module forward (Haar)."""
    xf = x.astype(jnp.float32)
    a = xf[:, :, 0::2, 0::2]
    b = xf[:, :, 0::2, 1::2]
    c = xf[:, :, 1::2, 0::2]
    d = xf[:, :, 1::2, 1::2]
    ll = 0.5 * (a + b + c + d)
    lh = 0.5 * (a - b + c - d)
    hl = 0.5 * (a + b - c - d)
    sm = jax.nn.softmax(lh + hl, axis=1)   # Softmax2d == softmax over channels
    return (ll + ll * sm).astype(x.dtype)


if __name__ == "__main__":
    key = jax.random.PRNGKey(0)
    N, C, H, W = 2, 4, 16, 16
    x = jax.random.normal(key, (N, C, H, W), dtype=jnp.float32)

    out = wad_forward(x)
    out = jax.block_until_ready(out)

    ref = _ref_forward(x)
    assert out.shape == (N, C, H // 2, W // 2)
    assert jnp.allclose(out, ref, atol=2e-5, rtol=2e-5), "mismatch vs reference"

    print("KERNEL_OK")
</pallas_src>

<mosaic_0001>
module attributes {stable_mosaic.version = 11 : i64} {
  func.func @_wad_kernel(%arg0: i32, %arg1: i32, %arg2: i32, %arg3: memref<1x4x16x16xf32, #tpu.memory_space<vmem>>, %arg4: memref<1x4x8x8xf32, #tpu.memory_space<vmem>>) attributes {dimension_semantics = [#tpu.dimension_semantics<parallel>, #tpu.dimension_semantics<parallel>, #tpu.dimension_semantics<parallel>], iteration_bounds = array<i64: 2, 1, 1>, scalar_prefetch = 0 : i64, scratch_operands = 0 : i64, tpu.core_type = #tpu.core_type<tc>, window_params = [{transform_indices = @transform_0, window_bounds = array<i64: 1, 4, 16, 16>}, {transform_indices = @transform_1, window_bounds = array<i64: 1, 4, 8, 8>}]} {
    %c0 = arith.constant 0 : index
    %c0_0 = arith.constant 0 : index
    %c0_1 = arith.constant 0 : index
    %c0_2 = arith.constant 0 : index
    %0 = tpu.strided_load %arg3[%c0, %c0_0, %c0_1, %c0_2] {strides = array<i32: 1, 1, 2, 1>} : memref<1x4x16x16xf32, #tpu.memory_space<vmem>>, vector<1x4x8x16xf32>
    %c0_3 = arith.constant 0 : index
    %c0_4 = arith.constant 0 : index
    %c1 = arith.constant 1 : index
    %c0_5 = arith.constant 0 : index
    %1 = tpu.strided_load %arg3[%c0_3, %c0_4, %c1, %c0_5] {strides = array<i32: 1, 1, 2, 1>} : memref<1x4x16x16xf32, #tpu.memory_space<vmem>>, vector<1x4x8x16xf32>
    %2 = vector.shape_cast %0 : vector<1x4x8x16xf32> to vector<32x16xf32>
    %3 = vector.shape_cast %1 : vector<1x4x8x16xf32> to vector<32x16xf32>
    %4 = tpu.iota {dimensions = array<i32: 0>} : vector<16x8xi32>
    %5 = tpu.iota {dimensions = array<i32: 1>} : vector<16x8xi32>
    %c2_i32 = arith.constant 2 : i32
    %6 = vector.broadcast %c2_i32 : i32 to vector<16x8xi32>
    %7 = arith.muli %6, %5 : vector<16x8xi32>
    %8 = arith.cmpi eq, %4, %7 : vector<16x8xi32>
    %9 = arith.extui %8 : vector<16x8xi1> to vector<16x8xi32>
    %10 = arith.sitofp %9 : vector<16x8xi32> to vector<16x8xf32>
    %c2_i32_6 = arith.constant 2 : i32
    %11 = vector.broadcast %c2_i32_6 : i32 to vector<16x8xi32>
    %12 = arith.muli %11, %5 : vector<16x8xi32>
    %c1_i32 = arith.constant 1 : i32
    %13 = vector.broadcast %c1_i32 : i32 to vector<16x8xi32>
    %14 = arith.addi %12, %13 : vector<16x8xi32>
    %15 = arith.cmpi eq, %4, %14 : vector<16x8xi32>
    %16 = arith.extui %15 : vector<16x8xi1> to vector<16x8xi32>
    %17 = arith.sitofp %16 : vector<16x8xi32> to vector<16x8xf32>
    %18 = arith.addf %10, %17 : vector<16x8xf32>
    %19 = arith.addf %2, %3 : vector<32x16xf32>
    %cst = arith.constant dense<0.000000e+00> : vector<32x8xf32>
    %20 = tpu.matmul %2, %10, %cst {dimension_numbers = #tpu.dot_dimension_numbers<[1], [0], [0], [1], [0, 0, 1, 1], [], []>} : vector<32x16xf32>, vector<16x8xf32>, vector<32x8xf32> -> vector<32x8xf32>
    %cst_7 = arith.constant dense<0.000000e+00> : vector<32x8xf32>
    %21 = tpu.matmul %3, %17, %cst_7 {dimension_numbers = #tpu.dot_dimension_numbers<[1], [0], [0], [1], [0, 0, 1, 1], [], []>} : vector<32x16xf32>, vector<16x8xf32>, vector<32x8xf32> -> vector<32x8xf32>
    %cst_8 = arith.constant dense<0.000000e+00> : vector<32x8xf32>
    %22 = tpu.matmul %19, %18, %cst_8 {dimension_numbers = #tpu.dot_dimension_numbers<[1], [0], [0], [1], [0, 0, 1, 1], [], []>} : vector<32x16xf32>, vector<16x8xf32>, vector<32x8xf32> -> vector<32x8xf32>
    %23 = arith.subf %20, %21 : vector<32x8xf32>
    %cst_9 = arith.constant 5.000000e-01 : f32
    %24 = vector.broadcast %cst_9 : f32 to vector<32x8xf32>
    %25 = arith.mulf %24, %22 : vector<32x8xf32>
    %26 = vector.shape_cast %25 : vector<32x8xf32> to vector<1x4x8x8xf32>
    %27 = vector.shape_cast %23 : vector<32x8xf32> to vector<1x4x8x8xf32>
    %cst_10 = arith.constant dense<0xFF800000> : vector<1x8x8xf32>
    %28 = vector.multi_reduction <maximumf>, %27, %cst_10 [1] : vector<1x4x8x8xf32> to vector<1x8x8xf32>
    %29 = vector.shape_cast %28 : vector<1x8x8xf32> to vector<1x1x8x8xf32>
    %30 = vector.broadcast %29 : vector<1x1x8x8xf32> to vector<1x4x8x8xf32>
    %31 = arith.subf %27, %30 : vector<1x4x8x8xf32>
    %32 = math.exp %31 : vector<1x4x8x8xf32>
    %cst_11 = arith.constant dense<0.000000e+00> : vector<1x8x8xf32>
    %33 = vector.multi_reduction <add>, %32, %cst_11 [1] : vector<1x4x8x8xf32> to vector<1x8x8xf32>
    %34 = vector.shape_cast %33 : vector<1x8x8xf32> to vector<1x1x8x8xf32>
    %35 = tpu.reciprocal %34 : vector<1x1x8x8xf32> -> vector<1x1x8x8xf32>
    %36 = vector.broadcast %35 : vector<1x1x8x8xf32> to vector<1x4x8x8xf32>
    %37 = arith.mulf %32, %36 : vector<1x4x8x8xf32>
    %38 = arith.mulf %26, %37 : vector<1x4x8x8xf32>
    %39 = arith.addf %26, %38 : vector<1x4x8x8xf32>
    %c0_12 = arith.constant 0 : index
    %c0_13 = arith.constant 0 : index
    %c0_14 = arith.constant 0 : index
    %c0_15 = arith.constant 0 : index
    %40 = vector.load %arg4[%c0_12, %c0_13, %c0_14, %c0_15] : memref<1x4x8x8xf32, #tpu.memory_space<vmem>>, vector<1x4x8x8xf32>
    tpu.vector_store %arg4[%c0_12, %c0_13, %c0_14, %c0_15], %39 {strides = array<i32>} : memref<1x4x8x8xf32, #tpu.memory_space<vmem>>, vector<1x4x8x8xf32>,
    return
  }
  func.func @transform_0(%arg0: i32, %arg1: i32, %arg2: i32) -> (i32, i32, i32, i32) {
    %c0_i32 = arith.constant 0 : i32
    %c0_i32_0 = arith.constant 0 : i32
    return %arg0, %c0_i32, %arg1, %arg2 : i32, i32, i32, i32
  }
  func.func @transform_1(%arg0: i32, %arg1: i32, %arg2: i32) -> (i32, i32, i32, i32) {
    %c0_i32 = arith.constant 0 : i32
    %c0_i32_0 = arith.constant 0 : i32
    return %arg0, %c0_i32, %arg1, %arg2 : i32, i32, i32, i32
  }
}

</mosaic_0001>

<bundles_post_ra>
// kernel: tpu_custom_call.1
= control target key start
LH: loop header
LB: loop body
LE: loop exit
PB: predicated region body
PF: predicated region fallthrough
CT: control target
= control target key end

     0   :  { %6 = vsyncpa [#allocation3], 0  ;;  %s1183_s0 = inlined_call_operand.hbm [shape: f32[2,4,16,16], index: 0, kind: input, shape index: {}]   ;;  %s1184_s1 = inlined_call_operand.hbm [shape: f32[2,4,8,8], index: 1, kind: output, shape index: {}]  }
   0x1   :  { %8 = vsyncpa [#allocation3 + $0x1], 0 }
   0x2   :  { %9 = vsyncpa [#allocation4], 0 }
   0x3   :  { %11 = vsyncpa [#allocation4 + $0x1], 0  ;;  %s973_s6 = smov 0   ;;  %s975_s7 = smov 0  }
   0x4   :  { %s977_s8 = smov 0   ;;  %s979_s9 = smov 0  }
   0x5   :  { %s981_s10 = smov 0   ;;  %s983_s11 = smov 0  }
   0x6 LB: > { %s657_s12 = sadd.s32 4294967295, %s953_s11   ;;  %s658_s13 = sadd.s32 4294967294, %s953_s11   ;;  %s953_s11 = sphi %s983_s11, %s17_s11   ;;  %s949_s10 = sphi %s981_s10, %s1199_s10   ;;  %s945_s9 = sphi %s979_s9, %s1198_s9   ;;  %s941_s8 = sphi %s977_s8, %s1197_s8   ;;  %s937_s7 = sphi %s975_s7, %s1196_s7   ;;  %s933_s6 = sphi %s973_s6, %s1195_s6  }
   0x7   : > { %s36_s14 = sadd.s32 1, %s949_s10  ;;  %s47_s15 = sadd.s32 1, %s941_s8 }
   0x8   : > { %p38_p0 = scmp.ge.s32.totalorder %s36_s14, 2  ;;  %p54_p1 = scmp.ne.s32.totalorder %s941_s8, %s937_s7 }
   0x9   : > { %p55_p2 = scmp.eq.s32.totalorder %s953_s11, 0  ;;  %p60_p3 = scmp.ne.s32.totalorder %s937_s7, %s933_s6 }
   0xa   : > { %s1201_s14 = smov (%p38_p0, %s36_s14), 0  ;;  %p61_p5 = scmp.eq.s32.totalorder %s657_s12, 0 }
   0xb   : > { %p1014_p4 = por %p55_p2, %p54_p1  ;;  %s40_s17 = ssub.s32 %s949_s10, %s1201_s14 }
   0xc   : > { %p88_p6 = scmp.eq.s32.totalorder %s657_s12, 1  ;;  %p45_p7 = scmp.eq.s32.totalorder %s40_s17, 0 }
   0xd   : > { %p1020_p8 = por %p61_p5, %p60_p3  ;;  %p94_p10 = scmp.eq.s32.totalorder %s658_s13, 1 }
   0xe   : > { %p1024_p9 = por %p88_p6, %p54_p1  ;;  %p775_p13 = scmp.lt.s32.totalorder %s953_s11, 2 }
   0xf   : > { %s1029_s20 = scalar_select %p45_p7, %s941_s8, %s47_s15  }
  0x10   : > { %s1188_s19 = scalar_select %p1024_p9, 1, 0 }
  0x11   : > { %p1031_p11 = por %p94_p10, %p60_p3  ;;  %s114_s22 = sand.u32 1, %s941_s8  }
  0x12   : > { %s661_s23 = sshll.u32 %s114_s22, 6  ;;  %s699_s24 = sshll.u32 %s949_s10, 10 }
  0x13   : > { %s1189_s21 = scalar_select %p1031_p11, 1, 0 }
  0x14   : > { %s1042_s27 = scalar_lea.hbm %s1183_s0, %s699_s24  ;;  %s118_s28 = scalar_lea.vmem [#allocation2], %s661_s23 }
  0x15   : > { %s128_s29 = sshll.u32 %s118_s28, 4  ;;  %p1048_p0 = pnand %p775_p13, %p1014_p4  ;;  %s1044_s29 = int_to_ptr.vmem [resolvable:$true] %s128_s29 }
  0x16   : > { %s1053_s2 = scalar_lea.sflag [#allocation3], %s114_s22  ;;  %s841_s3 = scalar_lea.hbm %s1042_s27, 1024 }
  0x17   : > { %p842_p2 = scmp.ne.s32.totalorder %s1042_s27, %s841_s3  ;;  %p843_p3 = pneg %p1048_p0 }
  0x18   : > { %s846_s12 = scalar_lea.hbm %s1183_s0, 2048  ;;  %p847_p4 = scmp.lt.u32.totalorder %s1042_s27, %s1183_s0 }
  0x19   : > { %p844_p5 = pnand %p843_p3, %p842_p2  ;;  %p848_p7 = scmp.lt.u32.totalorder %s846_s12, %s841_s3 }
  0x1a   : > { %p850_p13 = scmp.lt.u32.totalorder %s841_s3, %s1042_s27 }
  0x1b   : > { %p845_p6 = pneg %p844_p5  ;;  %p849_p10 = por %p848_p7, %p847_p4 }
  0x1d   : > { %p851_p12 = por %p850_p13, %p849_p10 }
  0x1f   : > { %p852_p1 = pnand %p851_p12, %p845_p6 }
  0x21   : > { %855 = shalt.err (!%p852_p1)
}
  0x22   : > { %s856_s16 = scalar_lea.vmem %s1044_s29, 1024  ;;  %s955_s17 = smov [#allocation2]  }
  0x23   : > { %p857_p2 = scmp.ne.s32.totalorder %s1044_s29, %s856_s16  ;;  %s861_s22 = sshll.u32 %s955_s17, 4  ;;  %s862_s22 = int_to_ptr.vmem [resolvable:$false] %s861_s22 }
  0x24   : > { %s863_s23 = scalar_lea.vmem %s862_s22, 2048  ;;  %p864_p9 = scmp.lt.s32.totalorder %s1044_s29, %s862_s22 }
  0x25   : > { %p859_p5 = pnand %p857_p2, %p843_p3  ;;  %p865_p4 = scmp.lt.s32.totalorder %s863_s23, %s856_s16 }
  0x27   : > { %p860_p11 = pneg %p859_p5  ;;  %p866_p7 = por %p865_p4, %p864_p9 }
  0x29   : > { %p867_p10 = pnand %p866_p7, %p860_p11 }
  0x2b   : > { %870 = shalt.err (!%p867_p10)
}
  0x2c   : > { %s956_s24 = smov 128   ;;  %s957_s25 = smov 8  }
  0x2d   : > { %770 = dma.hbm_to_vmem [thread:$0]  (!%p1048_p0), %s1042_s27, 1024, %s1044_s29, %s1053_s2, %s956_s24, %s956_s24, %s957_s25  }
  0x2e   : > { %p136_p12 = scmp.lt.s32.totalorder %s953_s11, 3  ;;  %p1191_p1 = scmp.ge.s32.totalorder %s953_s11, 1 }
  0x30   : > { %p137_p3 = pnand %p1191_p1, %p136_p12 }
  0x31   : > { %s1085_s26 = sand.u32 (!%p137_p3), 1, %s937_s7  }
  0x32   : > { %140 = sbr.rel (%p137_p3) target bundleno = 354 (0x162), region = 24  ;;  %s665_s28 = sshll.u32 (!%p137_p3), %s1085_s26, 6 }
  0x33   : > { %s143_s3 = scalar_lea.sflag (!%p137_p3), [#allocation3], %s1085_s26  ;;  %s1089_s4 = scalar_lea.vmem (!%p137_p3), [#allocation2], %s665_s28 }
  0x39   : > { %924 = dma.done.wait (%p1020_p8), %s143_s3, 1024  }
  0x3a   : > { %926 = vsyncadd (%p1020_p8), %s143_s3, 4294966272  ;;  %v181_v0 = vlaneseq  ;;  %vm206_vm0 = vcmask 130048   ;;  %v958_v6 = vmov 0.0   ;;  %v668_v9 = vld [vmem:[%s1089_s4 + $0x20] ss:$2 sm:$0xff]  ;;  %vm506_vm7 = vcmask 64512  }
  0x3b   : > { %v959_v10 = vmov 1.0|1.0   ;;  %726 = vmatprep.mubr.msk.f32.mxu1 %vm206_vm0, %v668_v9  ;;  %v166_v11 = vld [vmem:[%s1089_s4] ss:$2 sm:$0xff]  ;;  %v669_v12 = vld [vmem:[%s1089_s4 + $0x30] ss:$2 sm:$0xff] }
  0x3c   : > { %v182_v1 = vshrl.u32 %v181_v0, 7  ;;  %v185_v2 = vand.u32 127, %v181_v0  ;;  %v670_v15 = vld [vmem:[%s1089_s4 + $0x1] ss:$2 sm:$0xff]  ;;  %723 = vmatprep.mubr.msk.f32.mxu0 %vm206_vm0, %v166_v11  ;;  %v667_v19 = vld [vmem:[%s1089_s4 + $0x10] ss:$2 sm:$0xff] }
  0x3d   : > { %v202_v18 = vadd.f32 %v670_v15, %v166_v11  ;;  %v671_v21 = vld [vmem:[%s1089_s4 + $0x11] ss:$2 sm:$0xff]  ;;  %v672_v22 = vld [vmem:[%s1089_s4 + $0x21] ss:$2 sm:$0xff]  ;;  %s666_s18 = sshll.u32 %s1085_s26, 5  ;;  %s700_s30 = sshll.u32 %s945_s9, 9 }
  0x3e   : > { %v183_v3 = vadd.s32 8, %v182_v1  ;;  %v186_v4 = vmul.u32 2, %v185_v2  ;;  %v203_v23 = vadd.f32 %v671_v21, %v667_v19  ;;  %v204_v24 = vadd.f32 %v672_v22, %v668_v9  ;;  %v673_v25 = vld [vmem:[%s1089_s4 + $0x31] ss:$2 sm:$0xff]  ;;  %s164_s27 = scalar_lea.vmem [#allocation5], %s666_s18  ;;  %s1130_s12 = scalar_lea.hbm %s1184_s1, %s700_s30 }
  0x3f   : > { %v205_v26 = vadd.f32 %v673_v25, %v669_v12  ;;  %s566_s29 = sshll.u32 %s164_s27, 4  ;;  %s551_s9 = scalar_lea.sflag [#allocation4], %s1085_s26  ;;  %s1125_s29 = int_to_ptr.vmem [resolvable:$true] %s566_s29 }
  0x40   : > { %vm187_vm1 = vcmp.eq.s32.totalorder %v182_v1, %v186_v4  ;;  %vm188_vm2 = vcmp.eq.s32.totalorder %v183_v3, %v186_v4  ;;  %v193_v5 = vadd.s32 1, %v186_v4  ;;  %s871_s13 = scalar_lea.vmem %s1125_s29, 512  ;;  %p1192_p9 = scmp.ne.s32.totalorder %s1188_s19, 0 }
  0x41   : > { %v674_v7 = vsel %vm187_vm1, 1.0, %v958_v6  ;;  %v675_v8 = vsel %vm188_vm2, 1.0, %v958_v6  ;;  %vm749_vm3 = vmpackc.low %vm188_vm2, %vm187_vm1  ;;  %p872_p8 = scmp.ne.s32.totalorder %s1125_s29, %s871_s13  ;;  %s960_s15 = smov [#allocation5]  }
  0x42   : > { %761 = vmatprep.subr.msk.bf16.mxu1 %vm749_vm3, %v959_v10  ;;  %vm194_vm4 = vcmp.eq.s32.totalorder %v182_v1, %v193_v5  ;;  %vm195_vm5 = vcmp.eq.s32.totalorder %v183_v3, %v193_v5  ;;  %750 = vmatprep.subr.msk.bf16.mxu0 %vm749_vm3, %v959_v10  ;;  %s875_s16 = sshll.u32 %s960_s15, 4  ;;  %s876_s16 = int_to_ptr.vmem [resolvable:$false] %s875_s16 }
  0x43   : > { %762 = vmatpush3.bf16.msk.msra.mxu1 %vm749_vm3, %v959_v10  ;;  %v676_v13 = vsel %vm194_vm4, 1.0, %v958_v6  ;;  %v677_v14 = vsel %vm195_vm5, 1.0, %v958_v6  ;;  %vm753_vm6 = vmpackc.low %vm195_vm5, %vm194_vm4  ;;  %752 = vmatpush3.bf16.msk.msra.mxu0 %vm749_vm3, %v959_v10  ;;  %p873_p11 = pnand %p872_p8, %p1192_p9  ;;  %s877_s17 = scalar_lea.vmem %s876_s16, 1024 }
  0x44   : > { %754 = vmatprep.subr.msk.bf16.mxu1 %vm753_vm6, %v959_v10  ;;  %v200_v16 = vadd.f32 %v676_v13, %v674_v7  ;;  %v201_v17 = vadd.f32 %v677_v14, %v675_v8  ;;  %p878_p6 = scmp.lt.s32.totalorder %s1125_s29, %s876_s16  ;;  %p879_p13 = scmp.lt.s32.totalorder %s877_s17, %s871_s13 }
  0x45   : > { %p874_p0 = pneg %p873_p11 }
  0x46   : > { %727 = vmatmul.mubr.msk.f32.vlgmr.msra.gmra.mrb[0].mxu1 %vm206_vm0, %v669_v12  ;;  %v757_v20 = vpack.c.bf16 %v201_v17, %v200_v16  ;;  %724 = vmatmul.mubr.msk.f32.vlgmr.msra.gmra.mrb[0].mxu0 %vm206_vm0, %v667_v19  ;;  %p880_p2 = por %p879_p13, %p878_p6 }
  0x47   : > { %756 = vmatpush3.bf16.msk.msra.mxu1 %vm753_vm6, %v959_v10  ;;  %733 = vmatprep.mubr.msk.f32.mxu1 %vm206_vm0, %v670_v15 }
  0x48   : > { %758 = vmatprep.subr.bf16.mxu0 %v757_v20  ;;  %743 = vmatprep.mubr.msk.f32.mxu0 %vm206_vm0, %v202_v18  ;;  %p881_p5 = pnand %p880_p2, %p874_p0 }
  0x49   : > { %760 = vmatpush3.bf16.msra.mxu0 %v757_v20 }
  0x4a   : > { %734 = vmatmul.mubr.msk.f32.vlgmr.msra.gmra.mrb[2].mxu1 %vm206_vm0, %v671_v21 }
  0x4b   : > { %736 = vmatprep.mubr.msk.f32.mxu1 %vm206_vm0, %v672_v22 }
  0x4c   : > { %744 = vmatmul.mubr.msk.f32.vlgmr.msra.gmra.mrb[2].mxu0 %vm206_vm0, %v203_v23 }
  0x4d   : > { %746 = vmatprep.mubr.msk.f32.mxu0 %vm206_vm0, %v204_v24 }
  0x4e   : > { %737 = vmatmul.mubr.msk.f32.gmra.mrb[4].mxu1 %vm206_vm0, %v673_v25 }
  0x50   : > { %747 = vmatmul.mubr.msk.f32.gmra.mrb[4].mxu0 %vm206_vm0, %v205_v26 }
 0x119   : > { %v728_v27 = vpop.f32.mrb[0].mxu1  ;;  %v725_v29 = vpop.f32.mrb[0].mxu0 }
 0x11a   : > { %v295_v28 = vpop.f32.mrb[1].mxu1  ;;  %v285_v30 = vpop.f32.mrb[1].mxu0 }
 0x11d   : > { %v735_v31 = vpop.f32.mrb[2].mxu1 }
 0x11e   : > { %v499_v32 = vsub.f32 %v725_v29, %v735_v31  ;;  %v382_v33 = vpop.f32.mrb[3].mxu1 }
 0x11f   : > { %v498_v34 = vsub.f32 %v285_v30, %v382_v33  ;;  %v745_v35 = vpop.f32.mrb[2].mxu0 }
 0x120   : > { %v508_v36 = vsel %vm506_vm7, %v499_v32, -inf  ;;  %v479_v37 = vpop.f32.mrb[3].mxu0  ;;  %v503_v8 = vmul.f32 0.5, %v745_v35 }
 0x121   : > { %v507_v38 = vsel %vm506_vm7, %v498_v34, -inf  ;;  %v738_v39 = vpop.f32.mrb[4].mxu1  ;;  %v502_v9 = vmul.f32 0.5, %v479_v37 }
 0x122   : > { %v511_v40 = vmax.f32 %v507_v38, %v508_v36  ;;  %v501_v41 = vsub.f32 %v728_v27, %v738_v39  ;;  %v392_v42 = vpop.f32.mrb[5].mxu1 }
 0x123   : > { %v500_v43 = vsub.f32 %v295_v28, %v392_v42  ;;  %v748_v44 = vpop.f32.mrb[4].mxu0 }
 0x124   : > { %v510_v45 = vsel %vm506_vm7, %v501_v41, -inf  ;;  %v489_v46 = vpop.f32.mrb[5].mxu0  ;;  %v505_v5 = vmul.f32 0.5, %v748_v44 }
 0x125   : > { %v509_v47 = vsel %vm506_vm7, %v500_v43, -inf  ;;  %v504_v6 = vmul.f32 0.5, %v489_v46 }
 0x126   : > { %v512_v48 = vmax.f32 %v509_v47, %v510_v45 }
 0x128   : > { %v513_v49 = vmax.f32 %v511_v40, %v512_v48 }
 0x12a   : > { %v514_v50 = vsub.f32 %v498_v34, %v513_v49  ;;  %v515_v51 = vsub.f32 %v499_v32, %v513_v49  ;;  %v516_v52 = vsub.f32 %v500_v43, %v513_v49  ;;  %v517_v53 = vsub.f32 %v501_v41, %v513_v49 }
 0x12c   : > { %v518_v54 = vmul.f32 1.442695, %v514_v50  ;;  %v520_v55 = vmul.f32 1.442695, %v515_v51  ;;  %v522_v56 = vmul.f32 1.442695, %v516_v52 }
 0x12d   : > { %v524_v57 = vmul.f32 1.442695, %v517_v53 }
 0x12e   : > { %831 = vpow2.f32 %v518_v54 }
 0x12f   : > { %833 = vpow2.f32 %v520_v55 }
 0x130   : > { %835 = vpow2.f32 %v522_v56 }
 0x131   : > { %837 = vpow2.f32 %v524_v57 }
 0x138   : > { %v832_v58 = vpop.eup %831 }
 0x139   : > { %v834_v59 = vpop.eup %833  ;;  %v526_v60 = vsel %vm506_vm7, %v832_v58, 0.0 }
 0x13a   : > { %v836_v61 = vpop.eup %835  ;;  %v527_v62 = vsel %vm506_vm7, %v834_v59, 0.0 }
 0x13b   : > { %v838_v63 = vpop.eup %837  ;;  %v528_v0 = vadd.f32 %v527_v62, %v526_v60  ;;  %v529_v1 = vsel %vm506_vm7, %v836_v61, 0.0 }
 0x13c   : > { %v531_v3 = vsel %vm506_vm7, %v838_v63, 0.0 }
 0x13d   : > { %v530_v2 = vadd.f32 %v529_v1, %v528_v0 }
 0x13f   : > { %v532_v4 = vadd.f32 %v531_v3, %v530_v2 }
 0x141   : > { %839 = vrcp.f32 %v532_v4 }
 0x14b   : > { %v840_v7 = vpop.eup %839 }
 0x14c   : > { %v535_v10 = vmul.f32 %v840_v7, %v834_v59  ;;  %v534_v11 = vmul.f32 %v840_v7, %v832_v58  ;;  %v537_v12 = vmul.f32 %v840_v7, %v838_v63  ;;  %v536_v13 = vmul.f32 %v840_v7, %v836_v61 }
 0x14e   : > { %v539_v14 = vmul.f32 %v535_v10, %v503_v8  ;;  %v538_v15 = vmul.f32 %v534_v11, %v502_v9  ;;  %v541_v16 = vmul.f32 %v537_v12, %v505_v5  ;;  %v540_v17 = vmul.f32 %v536_v13, %v504_v6 }
 0x150   : > { %v543_v18 = vadd.f32 %v539_v14, %v503_v8  ;;  %v542_v19 = vadd.f32 %v538_v15, %v502_v9  ;;  %v545_v20 = vadd.f32 %v541_v16, %v505_v5  ;;  %v544_v21 = vadd.f32 %v540_v17, %v504_v6 }
 0x152   : > { %547 = vst.msk [vmem:[%s164_s27 + $0x8] sm:$0xff] %vm506_vm7, %v543_v18  ;;  %546 = vst.msk [vmem:[%s164_s27] sm:$0xff] %vm506_vm7, %v542_v19 }
 0x153   : > { %549 = vst.msk [vmem:[%s164_s27 + $0x18] sm:$0xff] %vm506_vm7, %v545_v20  ;;  %548 = vst.msk [vmem:[%s164_s27 + $0x10] sm:$0xff] %vm506_vm7, %v544_v21 }
 0x154   : > { %884 = shalt.err (!%p881_p5)
}
 0x155   : > { %s885_s22 = scalar_lea.hbm %s1130_s12, 512  ;;  %s889_s25 = scalar_lea.hbm %s1184_s1, 1024 }
 0x156   : > { %p886_p4 = scmp.ne.s32.totalorder %s1130_s12, %s885_s22  ;;  %p890_p12 = scmp.lt.u32.totalorder %s1130_s12, %s1184_s1 }
 0x157   : > { %p891_p1 = scmp.lt.u32.totalorder %s889_s25, %s885_s22  ;;  %p893_p8 = scmp.lt.u32.totalorder %s885_s22, %s1130_s12 }
 0x158   : > { %p887_p7 = pnand %p886_p4, %p1192_p9 }
 0x159   : > { %p892_p3 = por %p891_p1, %p890_p12 }
 0x15a   : > { %p888_p10 = pneg %p887_p7 }
 0x15b   : > { %p894_p11 = por %p893_p8, %p892_p3 }
 0x15d   : > { %p895_p0 = pnand %p894_p11, %p888_p10 }
 0x15f   : > { %898 = shalt.err (!%p895_p0)
}
 0x160   : > { %s961_s4 = smov 128   ;;  %s962_s18 = smov 8  }
 0x161   : > { %765 = dma.vmem_to_hbm [thread:$0]  (%p1192_p9), %s1125_s29, 512, %s1130_s12, %s551_s9, %s961_s4, %s961_s4, %s962_s18  }
 0x162 PF: > { %s581_s27 = sand.u32 1, %s933_s6   ;;  %p1193_p6 = scmp.ne.s32.totalorder %s1189_s21, 0 }
 0x163   : > { %p1194_p13 = scmp.ge.s32.totalorder %s953_s11, 2  ;;  %s582_s30 = scalar_lea.sflag [#allocation4], %s581_s27 }
 0x165   : > { %p772_p2 = pnand %p1194_p13, %p1193_p6 }
 0x167   : > { %928 = dma.done.wait (!%p772_p2), %s582_s30, 512  }
 0x168   : > { %930 = vsyncadd (!%p772_p2), %s582_s30, 4294966784  ;;  %s17_s11 = sadd.s32 1, %s953_s11   ;;  %s1195_s6 = smov %s937_s7 }
 0x169   : > { %p14_p5 = scmp.ge.s32.totalorder %s17_s11, 4   ;;  %s1196_s7 = smov %s941_s8 }
 0x16a   : > { %s1197_s8 = smov %s1029_s20  ;;  %s1198_s9 = smov %s949_s10 }
 0x16b   : > { %s1199_s10 = smov %s1201_s14  ;;  %16 = sbr.rel (!%p14_p5) target bundleno = 6 (0x6), region = 76 }
 0x172   :  { %587 = vsyncpa [#allocation3], 1 }
 0x173   :  { %589 = vsyncpa [#allocation3 + $0x1], 1 }
 0x174   :  { %590 = vsyncpa [#allocation4], 1 }
 0x175   :  { %592 = vsyncpa [#allocation4 + $0x1], 1 }

</bundles_post_ra>
